<compile_context>
chip_gen: v6e
topology: v6e:2x2x1
jax: 0.10.0
libtpu: 0.0.40
codegen_flags: <defaults>
</compile_context>

<pallas_src>
import math

import jax
import jax.numpy as jnp
from jax.experimental import pallas as pl
from jax.experimental.pallas import tpu as pltpu

# The reference repo adds a tiny epsilon to the intersection only.
EPS = 1e-7

_LANE = 128
_BLOCK_BUDGET_BYTES = 12 * 1024 * 1024   # all double-buffered input blocks
_VMEM_LIMIT_BYTES = 32 * 1024 * 1024     # safe on v5e/v6e (128 MiB) and per-TC v7x (64 MiB)
_MIN_TILE = 512                          # below this, lane-width HBM efficiency drops
_MAX_TILE = 4096                         # keeps the unrolled lane-chunk loop short
_MIN_STEPS = 8                           # target reduction-grid depth for DMA/compute overlap
_NEG_PAD = -1.0e4                        # sigmoid(_NEG_PAD) == 0.0 exactly in f32


def _make_dice_kernel(tile, weighted):
    """Kernel body: per-row, lane-wide partial sums of intersection & denominator."""

    def kernel(*refs):
        if weighted:
            x_ref, t_ref, w_ref, inter_ref, den_ref = refs
        else:
            x_ref, t_ref, inter_ref, den_ref = refs
            w_ref = None

        k = pl.program_id(1)                         # reduction ("arbitrary") axis

        @pl.when(k == 0)
        def _():
            inter_ref[...] = jnp.zeros_like(inter_ref)
            den_ref[...] = jnp.zeros_like(den_ref)

        x = x_ref[...].astype(jnp.float32)
        t = t_ref[...].astype(jnp.float32)
        # sigmoid via tanh: one EUP op per element.
        p = 0.5 * (jnp.tanh(0.5 * x) + 1.0)
        if weighted:
            w = w_ref[...].astype(jnp.float32)
            p = p * w
            t = t * w
        pt = p * t                                   # intersection terms
        pd = p + t                                   # fused denominator terms

        # Lane-wide accumulation: 128-column (lane-aligned) chunk adds are pure
        # VALU vreg adds; the cross-lane (XLU) reduce is deferred to the wrapper.
        acc_i = inter_ref[...]
        acc_d = den_ref[...]
        for c in range(0, tile, _LANE):
            acc_i = acc_i + pt[:, c:c + _LANE]
            acc_d = acc_d + pd[:, c:c + _LANE]
        inter_ref[...] = acc_i
        den_ref[...] = acc_d

    return kernel


def _choose_tile(rows, feat_lane, itemsize_sum):
    """Lane-aligned feature tile: fits the VMEM budget, targets >= _MIN_STEPS steps."""
    budget_tile = (_BLOCK_BUDGET_BYTES // (2 * rows * itemsize_sum)) // _LANE * _LANE
    budget_tile = max(budget_tile, _LANE)
    steps_tile = max(_LANE, (feat_lane // _MIN_STEPS) // _LANE * _LANE)
    tile = min(budget_tile, _MAX_TILE, max(_MIN_TILE, steps_tile), feat_lane)
    return max(tile, _LANE)


def dice_loss_pallas(inputs, target, weight=None, size_average=True):
    """JAX/Pallas equivalent of DiceLoss(size_average).forward(input, target, weight)."""
    n = inputs.shape[0]
    feat = math.prod(inputs.shape[1:])

    # Sublane packing: view each sample as `pack` rows so vreg sublanes are
    # densely used even for tiny batches (per-sample sums are reshape-invariant).
    pack = 1
    if n < 8:
        for cand in (8, 4, 2):
            if feat % cand == 0:
                pack = cand
                break
    rows = n * pack
    feat2 = feat // pack

    x2 = inputs.reshape(rows, feat2)
    t2 = target.reshape(rows, feat2)
    operands = [x2, t2]

    weighted = weight is not None
    if weighted:
        w_arr = jnp.asarray(weight)
        if w_arr.size == n * feat:
            w_full = w_arr.reshape(inputs.shape)
        elif w_arr.ndim == 1 and w_arr.shape[0] == n:
            # Per-sample weights: broadcast along features, not the trailing axis.
            w_full = jnp.broadcast_to(
                w_arr.reshape((n,) + (1,) * (inputs.ndim - 1)), inputs.shape)
        else:
            # TODO(synk): small per-channel weights could be expanded in-kernel
            # (SMEM + broadcast) instead of materializing a full HBM slab.
            w_full = jnp.broadcast_to(w_arr, inputs.shape)
        operands.append(w_full.reshape(rows, feat2))

    itemsize_sum = sum(op.dtype.itemsize for op in operands)
    feat_lane = pl.cdiv(feat2, _LANE) * _LANE
    tile = _choose_tile(rows, feat_lane, itemsize_sum)

    k_total = pl.cdiv(feat2, tile)
    n_split = 2 if k_total >= 2 else 1          # use both TensorCores on v7x
    k_steps = pl.cdiv(k_total, n_split)
    feat_padded = n_split * k_steps * tile

    pad = feat_padded - feat2
    if pad:
        # Neutral padding: sigmoid(_NEG_PAD) == 0 and target/weight pad == 0, so
        # padded columns contribute exactly zero to every partial sum.
        pad_vals = [_NEG_PAD, 0.0, 0.0]
        operands = [
            jnp.pad(op, ((0, 0), (0, pad)), constant_values=pv)
            for op, pv in zip(operands, pad_vals)
        ]

    kernel = _make_dice_kernel(tile, weighted)
    in_specs = [
        pl.BlockSpec((rows, tile), lambda s, k: (0, s * k_steps + k))
        for _ in operands
    ]
    out_specs = (
        pl.BlockSpec((None, rows, _LANE), lambda s, k: (s, 0, 0)),
        pl.BlockSpec((None, rows, _LANE), lambda s, k: (s, 0, 0)),
    )
    out_shape = (
        jax.ShapeDtypeStruct((n_split, rows, _LANE), jnp.float32),
        jax.ShapeDtypeStruct((n_split, rows, _LANE), jnp.float32),
    )

    total_elems = n * feat
    cost = pl.CostEstimate(
        flops=6 * total_elems,
        transcendentals=total_elems,             # one tanh per element
        bytes_accessed=sum(int(op.size) * op.dtype.itemsize for op in operands)
        + 2 * n_split * rows * _LANE * 4,
    )

    inter_p, den_p = pl.pallas_call(
        kernel,
        out_shape=out_shape,
        grid=(n_split, k_steps),
        in_specs=in_specs,
        out_specs=out_specs,
        compiler_params=pltpu.CompilerParams(
            dimension_semantics=("parallel", "arbitrary"),
            vmem_limit_bytes=_VMEM_LIMIT_BYTES,
        ),
        cost_estimate=cost,
    )(*operands)

    # O(rows) finalize in plain JAX: reduce splits + lanes + packed rows per
    # sample, then apply eps / +1 smoothing / clip exactly once.
    inter = inter_p.sum(axis=(0, 2)).reshape(n, pack).sum(axis=1) + EPS
    den = den_p.sum(axis=(0, 2)).reshape(n, pack).sum(axis=1)
    scores = 2.0 * (inter + 1.0) / (den + 1.0)
    if size_average:
        return 1.0 - jnp.clip(jnp.sum(scores) / n, 0.0, 1.0)
    return 1.0 - scores                          # per-sample vector (is_average=False)


def _dice_loss_ref(inputs, target, weight=None, size_average=True):
    """Pure-JAX reference mirroring the PyTorch code (sanity check)."""
    n = inputs.shape[0]
    p = jax.nn.sigmoid(inputs.astype(jnp.float32)).reshape(n, -1)
    t = target.reshape(n, -1).astype(jnp.float32)
    if weight is not None:
        w = jnp.asarray(weight)
        if w.size == n * p.shape[1]:
            w = w.reshape(n, -1).astype(jnp.float32)
        else:
            w = jnp.broadcast_to(w, inputs.shape).reshape(n, -1).astype(jnp.float32)
        p = p * w
        t = t * w
    inter = jnp.sum(p * t, axis=1) + EPS
    scores = 2.0 * (inter + 1.0) / (jnp.sum(p, axis=1) + jnp.sum(t, axis=1) + 1.0)
    if size_average:
        return 1.0 - jnp.clip(jnp.sum(scores) / n, 0.0, 1.0)
    return 1.0 - scores


if __name__ == "__main__":
    key = jax.random.PRNGKey(0)
    k1, k2, k3 = jax.random.split(key, 3)

    # Small NCHW shapes: batch=2, channels=4, spatial=16x16 -> flattened F=1024
    N, C, H, W = 2, 4, 16, 16
    x = jax.random.normal(k1, (N, C, H, W), dtype=jnp.float32)              # logits
    t = (jax.random.uniform(k2, (N, C, H, W)) > 0.5).astype(jnp.float32)    # binary mask

    # No-weight path (common case: only 2 HBM input streams).
    loss = jax.block_until_ready(dice_loss_pallas(x, t))
    ref = _dice_loss_ref(x, t)
    assert jnp.allclose(loss, ref, atol=1e-4, rtol=1e-4), (loss, ref)

    # Weighted path.
    w = jax.random.uniform(k3, (N, C, H, W), dtype=jnp.float32)
    loss_w = jax.block_until_ready(dice_loss_pallas(x, t, weight=w))
    ref_w = _dice_loss_ref(x, t, weight=w)
    assert jnp.allclose(loss_w, ref_w, atol=1e-4, rtol=1e-4), (loss_w, ref_w)

    print("KERNEL_OK")
</pallas_src>

<mosaic_0001>
module attributes {stable_mosaic.version = 11 : i64} {
  func.func @kernel(%arg0: i32, %arg1: i32, %arg2: memref<16x128xf32, #tpu.memory_space<vmem>>, %arg3: memref<16x128xf32, #tpu.memory_space<vmem>>, %arg4: memref<1x16x128xf32, #tpu.memory_space<vmem>>, %arg5: memref<1x16x128xf32, #tpu.memory_space<vmem>>) attributes {dimension_semantics = [#tpu.dimension_semantics<parallel>, #tpu.dimension_semantics<arbitrary>], iteration_bounds = array<i64: 1, 1>, scalar_prefetch = 0 : i64, scratch_operands = 0 : i64, tpu.core_type = #tpu.core_type<tc>, window_params = [{transform_indices = @transform_0, window_bounds = array<i64: 16, 128>}, {transform_indices = @transform_1, window_bounds = array<i64: 16, 128>}, {transform_indices = @transform_2, window_bounds = array<i64: 1, 16, 128>}, {transform_indices = @transform_3, window_bounds = array<i64: 1, 16, 128>}]} {
    %c0_i32 = arith.constant 0 : i32
    %0 = arith.cmpi eq, %arg1, %c0_i32 : i32
    %1 = arith.extui %0 : i1 to i32
    %c0_i32_0 = arith.constant 0 : i32
    %2 = arith.cmpi ne, %1, %c0_i32_0 : i32
    scf.if %2 {
      %cst_18 = arith.constant 0.000000e+00 : f32
      %26 = vector.broadcast %cst_18 : f32 to vector<16x128xf32>
      %c0_19 = arith.constant 0 : index
      %c0_20 = arith.constant 0 : index
      %c0_21 = arith.constant 0 : index
      %27 = vector.load %arg4[%c0_19, %c0_20, %c0_21] : memref<1x16x128xf32, #tpu.memory_space<vmem>>, vector<1x16x128xf32>
      %28 = vector.shape_cast %27 : vector<1x16x128xf32> to vector<16x128xf32>
      %29 = vector.shape_cast %26 : vector<16x128xf32> to vector<1x16x128xf32>
      tpu.vector_store %arg4[%c0_19, %c0_20, %c0_21], %29 {strides = array<i32>} : memref<1x16x128xf32, #tpu.memory_space<vmem>>, vector<1x16x128xf32>,
      %cst_22 = arith.constant 0.000000e+00 : f32
      %30 = vector.broadcast %cst_22 : f32 to vector<16x128xf32>
      %c0_23 = arith.constant 0 : index
      %c0_24 = arith.constant 0 : index
      %c0_25 = arith.constant 0 : index
      %31 = vector.load %arg5[%c0_23, %c0_24, %c0_25] : memref<1x16x128xf32, #tpu.memory_space<vmem>>, vector<1x16x128xf32>
      %32 = vector.shape_cast %31 : vector<1x16x128xf32> to vector<16x128xf32>
      %33 = vector.shape_cast %30 : vector<16x128xf32> to vector<1x16x128xf32>
      tpu.vector_store %arg5[%c0_23, %c0_24, %c0_25], %33 {strides = array<i32>} : memref<1x16x128xf32, #tpu.memory_space<vmem>>, vector<1x16x128xf32>,
    } else {
    }
    %c0 = arith.constant 0 : index
    %c0_1 = arith.constant 0 : index
    %3 = vector.load %arg2[%c0, %c0_1] : memref<16x128xf32, #tpu.memory_space<vmem>>, vector<16x128xf32>
    %c0_2 = arith.constant 0 : index
    %c0_3 = arith.constant 0 : index
    %4 = vector.load %arg3[%c0_2, %c0_3] : memref<16x128xf32, #tpu.memory_space<vmem>>, vector<16x128xf32>
    %cst = arith.constant 5.000000e-01 : f32
    %5 = vector.broadcast %cst : f32 to vector<16x128xf32>
    %6 = arith.mulf %5, %3 : vector<16x128xf32>
    %7 = math.tanh %6 : vector<16x128xf32>
    %cst_4 = arith.constant 1.000000e+00 : f32
    %8 = vector.broadcast %cst_4 : f32 to vector<16x128xf32>
    %9 = arith.addf %7, %8 : vector<16x128xf32>
    %cst_5 = arith.constant 5.000000e-01 : f32
    %10 = vector.broadcast %cst_5 : f32 to vector<16x128xf32>
    %11 = arith.mulf %10, %9 : vector<16x128xf32>
    %12 = arith.mulf %11, %4 : vector<16x128xf32>
    %13 = arith.addf %11, %4 : vector<16x128xf32>
    %c0_6 = arith.constant 0 : index
    %c0_7 = arith.constant 0 : index
    %c0_8 = arith.constant 0 : index
    %14 = vector.load %arg4[%c0_6, %c0_7, %c0_8] : memref<1x16x128xf32, #tpu.memory_space<vmem>>, vector<1x16x128xf32>
    %15 = vector.shape_cast %14 : vector<1x16x128xf32> to vector<16x128xf32>
    %c0_9 = arith.constant 0 : index
    %c0_10 = arith.constant 0 : index
    %c0_11 = arith.constant 0 : index
    %16 = vector.load %arg5[%c0_9, %c0_10, %c0_11] : memref<1x16x128xf32, #tpu.memory_space<vmem>>, vector<1x16x128xf32>
    %17 = vector.shape_cast %16 : vector<1x16x128xf32> to vector<16x128xf32>
    %18 = arith.addf %15, %12 : vector<16x128xf32>
    %19 = arith.addf %17, %13 : vector<16x128xf32>
    %c0_12 = arith.constant 0 : index
    %c0_13 = arith.constant 0 : index
    %c0_14 = arith.constant 0 : index
    %20 = vector.load %arg4[%c0_12, %c0_13, %c0_14] : memref<1x16x128xf32, #tpu.memory_space<vmem>>, vector<1x16x128xf32>
    %21 = vector.shape_cast %20 : vector<1x16x128xf32> to vector<16x128xf32>
    %22 = vector.shape_cast %18 : vector<16x128xf32> to vector<1x16x128xf32>
    tpu.vector_store %arg4[%c0_12, %c0_13, %c0_14], %22 {strides = array<i32>} : memref<1x16x128xf32, #tpu.memory_space<vmem>>, vector<1x16x128xf32>,
    %c0_15 = arith.constant 0 : index
    %c0_16 = arith.constant 0 : index
    %c0_17 = arith.constant 0 : index
    %23 = vector.load %arg5[%c0_15, %c0_16, %c0_17] : memref<1x16x128xf32, #tpu.memory_space<vmem>>, vector<1x16x128xf32>
    %24 = vector.shape_cast %23 : vector<1x16x128xf32> to vector<16x128xf32>
    %25 = vector.shape_cast %19 : vector<16x128xf32> to vector<1x16x128xf32>
    tpu.vector_store %arg5[%c0_15, %c0_16, %c0_17], %25 {strides = array<i32>} : memref<1x16x128xf32, #tpu.memory_space<vmem>>, vector<1x16x128xf32>,
    return
  }
  func.func @transform_0(%arg0: i32, %arg1: i32) -> (i32, i32) {
    %c1_i32 = arith.constant 1 : i32
    %0 = arith.muli %arg0, %c1_i32 : i32
    %1 = arith.addi %0, %arg1 : i32
    %c0_i32 = arith.constant 0 : i32
    %c0_i32_0 = arith.constant 0 : i32
    return %c0_i32, %1 : i32, i32
  }
  func.func @transform_1(%arg0: i32, %arg1: i32) -> (i32, i32) {
    %c1_i32 = arith.constant 1 : i32
    %0 = arith.muli %arg0, %c1_i32 : i32
    %1 = arith.addi %0, %arg1 : i32
    %c0_i32 = arith.constant 0 : i32
    %c0_i32_0 = arith.constant 0 : i32
    return %c0_i32, %1 : i32, i32
  }
  func.func @transform_2(%arg0: i32, %arg1: i32) -> (i32, i32, i32) {
    %c0_i32 = arith.constant 0 : i32
    %c0_i32_0 = arith.constant 0 : i32
    %c0_i32_1 = arith.constant 0 : i32
    return %arg0, %c0_i32, %c0_i32_0 : i32, i32, i32
  }
  func.func @transform_3(%arg0: i32, %arg1: i32) -> (i32, i32, i32) {
    %c0_i32 = arith.constant 0 : i32
    %c0_i32_0 = arith.constant 0 : i32
    %c0_i32_1 = arith.constant 0 : i32
    return %arg0, %c0_i32, %c0_i32_0 : i32, i32, i32
  }
}

</mosaic_0001>

<bundles_post_ra>
// kernel: tpu_custom_call.1
= control target key start
LH: loop header
LB: loop body
LE: loop exit
PB: predicated region body
PF: predicated region fallthrough
CT: control target
= control target key end

     0   :  { %9 = vsyncpa [#allocation3], 0  ;;  %s270_s0 = inlined_call_operand.hbm [shape: f32[16,128], index: 0, kind: input, shape index: {}]   ;;  %s271_s1 = inlined_call_operand.hbm [shape: f32[16,128], index: 1, kind: input, shape index: {}]   ;;  %s272_s2 = inlined_call_operand.hbm [shape: f32[1,16,128], index: 2, kind: output, shape index: {0}]   ;;  %s273_s3 = inlined_call_operand.hbm [shape: f32[1,16,128], index: 3, kind: output, shape index: {1}]  }
   0x1   :  { %10 = vsyncpa [#allocation6], 0 }
   0x2   :  { %11 = vsyncpa [#allocation4], 0 }
   0x3   :  { %12 = vsyncpa [#allocation9], 0  ;;  %s220_s12 = smov [#allocation2]  }
   0x4   :  { %s21_s13 = sshll.u32 %s220_s12, 4  ;;  %s22_s13 = int_to_ptr.vmem [resolvable:$true] %s21_s13 }
   0x5   :  { %s140_s14 = scalar_lea.vmem %s22_s13, 256  ;;  %p145_p1 = scmp.lt.s32.totalorder %s22_s13, %s22_s13 }
   0x6   :  { %p141_p0 = scmp.ne.s32.totalorder %s22_s13, %s140_s14  ;;  %p146_p2 = scmp.lt.s32.totalorder %s140_s14, %s140_s14 }
   0x8   :  { %p147_p3 = por %p146_p2, %p145_p1 }
   0xa   :  { %p148_p4 = pnand %p147_p3, %p141_p0 }
   0xc   :  { %151 = shalt.err (!%p148_p4)
}
   0xd   :  { %s221_s15 = smov 128   ;;  %s222_s16 = smov 8  }
   0xe   :  { %27 = dma.hbm_to_vmem [thread:$0]  %s270_s0, 256, %s22_s13, [#allocation3], %s221_s15, %s221_s15, %s222_s16  }
   0xf   :  { %s223_s19 = smov [#allocation5]  }
  0x10   :  { %s36_s20 = sshll.u32 %s223_s19, 4  ;;  %s37_s20 = int_to_ptr.vmem [resolvable:$true] %s36_s20 }
  0x11   :  { %s160_s21 = scalar_lea.vmem %s37_s20, 256  ;;  %p165_p6 = scmp.lt.s32.totalorder %s37_s20, %s37_s20 }
  0x12   :  { %p161_p5 = scmp.ne.s32.totalorder %s37_s20, %s160_s21  ;;  %p166_p7 = scmp.lt.s32.totalorder %s160_s21, %s160_s21 }
  0x14   :  { %p167_p8 = por %p166_p7, %p165_p6 }
  0x16   :  { %p168_p9 = pnand %p167_p8, %p161_p5 }
  0x18   :  { %171 = shalt.err (!%p168_p9)
}
  0x19   :  { %42 = dma.hbm_to_vmem [thread:$0]  %s271_s1, 256, %s37_s20, [#allocation6], %s221_s15, %s221_s15, %s222_s16  }
  0x1a   :  { %212 = dma.done.wait [#allocation3], 256  }
  0x1b   :  { %213 = vsyncadd [#allocation3], 4294967040 }
  0x1c   :  { %214 = dma.done.wait [#allocation6], 256  }
  0x1d   :  { %215 = vsyncadd [#allocation6], 4294967040  ;;  %v59_v0 = vld [vmem:[#allocation2] sm:$0xff]  ;;  %v60_v1 = vld [vmem:[#allocation2 + $0x8] sm:$0xff]  ;;  %s224_s0 = smov [#allocation7]   ;;  %s225_s24 = smov [#allocation8]  }
  0x1e   :  { %v63_v2 = vmul.f32 0.5, %v59_v0  ;;  %v64_v3 = vmul.f32 0.5, %v60_v1  ;;  %v61_v7 = vld [vmem:[#allocation5] sm:$0xff]  ;;  %v62_v10 = vld [vmem:[#allocation5 + $0x8] sm:$0xff]  ;;  %s92_s1 = sshll.u32 %s224_s0, 4  ;;  %s104_s25 = sshll.u32 %s225_s24, 4  ;;  %s93_s1 = int_to_ptr.vmem [resolvable:$true] %s92_s1  ;;  %s105_s25 = int_to_ptr.vmem [resolvable:$true] %s104_s25 }
  0x1f   :  { %s172_s26 = scalar_lea.vmem %s93_s1, 256  ;;  %p177_p11 = scmp.lt.s32.totalorder %s93_s1, %s93_s1 }
  0x20   :  { %128 = vtanh.f32 %v63_v2  ;;  %p173_p10 = scmp.ne.s32.totalorder %s93_s1, %s172_s26  ;;  %p178_p12 = scmp.lt.s32.totalorder %s172_s26, %s172_s26 }
  0x21   :  { %130 = vtanh.f32 %v64_v3 }
  0x22   :  { %p179_p13 = por %p178_p12, %p177_p11 }
  0x24   :  { %p180_p0 = pnand %p179_p13, %p173_p10 }
  0x2d   :  { %v129_v4 = vpop.eup %128 }
  0x2e   :  { %v131_v5 = vpop.eup %130  ;;  %v67_v6 = vadd.f32 1.0, %v129_v4 }
  0x2f   :  { %v68_v8 = vadd.f32 1.0, %v131_v5 }
  0x30   :  { %v69_v9 = vmul.f32 0.5, %v67_v6 }
  0x31   :  { %v70_v11 = vmul.f32 0.5, %v68_v8 }
  0x32   :  { %v71_v12 = vmul.f32 %v69_v9, %v61_v7  ;;  %v73_v13 = vadd.f32 %v69_v9, %v61_v7 }
  0x33   :  { %v72_v14 = vmul.f32 %v70_v11, %v62_v10  ;;  %v74_v15 = vadd.f32 %v70_v11, %v62_v10 }
  0x34   :  { %83 = vst [vmem:[#allocation7] sm:$0xff] %v71_v12  ;;  %85 = vst [vmem:[#allocation8] sm:$0xff] %v73_v13 }
  0x35   :  { %84 = vst [vmem:[#allocation7 + $0x8] sm:$0xff] %v72_v14  ;;  %86 = vst [vmem:[#allocation8 + $0x8] sm:$0xff] %v74_v15 }
  0x36   :  { %183 = shalt.err (!%p180_p0)
}
  0x37   :  { %98 = dma.vmem_to_hbm [thread:$0]  %s93_s1, 256, %s272_s2, [#allocation4], %s221_s15, %s221_s15, %s222_s16  }
  0x38   :  { %s192_s29 = scalar_lea.vmem %s105_s25, 256  ;;  %p197_p2 = scmp.lt.s32.totalorder %s105_s25, %s105_s25 }
  0x39   :  { %p193_p1 = scmp.ne.s32.totalorder %s105_s25, %s192_s29  ;;  %p198_p3 = scmp.lt.s32.totalorder %s192_s29, %s192_s29 }
  0x3b   :  { %p199_p4 = por %p198_p3, %p197_p2 }
  0x3d   :  { %p200_p5 = pnand %p199_p4, %p193_p1 }
  0x3f   :  { %203 = shalt.err (!%p200_p5)
}
  0x40   :  { %110 = dma.vmem_to_hbm [thread:$0]  %s105_s25, 256, %s273_s3, [#allocation9], %s221_s15, %s221_s15, %s222_s16  }
  0x41   :  { %216 = dma.done.wait [#allocation4], 256  }
  0x42   :  { %217 = vsyncadd [#allocation4], 4294967040 }
  0x43   :  { %218 = dma.done.wait [#allocation9], 256  }
  0x44   :  { %219 = vsyncadd [#allocation9], 4294967040 }
  0x45   :  { %117 = vsyncpa [#allocation3], 1 }
  0x46   :  { %118 = vsyncpa [#allocation6], 1 }
  0x47   :  { %119 = vsyncpa [#allocation4], 1 }
  0x48   :  { %120 = vsyncpa [#allocation9], 1 }

</bundles_post_ra>
